<compile_context>
chip_gen: v5e
topology: v5e:2x2
jax: 0.10.0
libtpu: 0.0.40
codegen_flags: <defaults>
</compile_context>

<pallas_src>
import math

import jax
import jax.numpy as jnp
from jax.experimental import pallas as pl
from jax.experimental.pallas import tpu as pltpu


def _copy_kernel(x_ref, o_ref):
    # Identity copy of the current (row_tile, lane) block.
    o_ref[...] = x_ref[...]


def _largest_divisor_tile(rows: int, max_rows: int, pack: int):
    """Largest divisor of `rows` that is <= max_rows and a multiple of the
    packed sublane count (preferred) or of 8 (hard layout requirement)."""
    mults = (pack, 8) if pack != 8 else (8,)
    for mult in mults:
        rt = (min(rows, max_rows) // mult) * mult
        while rt >= mult:
            if rows % rt == 0:
                return rt
            rt -= mult
    return None


def _pick_lane_dense_layout(total: int, itemsize: int, block_bytes: int):
    """Pick (lane, rows, row_tile) for the staging copy, or None for fallback."""
    # Packed sublane count: f32 -> 8, bf16 -> 16, int8/fp8 -> 32.
    pack = {4: 8, 2: 16, 1: 32}.get(itemsize, 8)
    whole_array_cap = 4 * 1024 * 1024  # cap for the "one block = whole array" path
    best_fallback = None
    for lane in (2048, 1024, 512, 256, 128):
        if total % lane:
            continue
        rows = total // lane
        max_rows = max(1, block_bytes // (lane * itemsize))
        rt = _largest_divisor_tile(rows, max_rows, pack)
        if rt is not None:
            return lane, rows, rt
        # Block row-dim equal to the full array row-dim is always layout-legal;
        # only take it if the whole array comfortably fits VMEM (v7x-safe).
        if best_fallback is None and rows * lane * itemsize <= whole_array_cap:
            best_fallback = (lane, rows, rows)
    return best_fallback


def reshape_last_dim_1d(x: jax.Array, out_features: int,
                        block_bytes: int = 2 * 1024 * 1024) -> jax.Array:
    """Equivalent of ReshapeLastDim1D(out_features)(x)."""
    total = math.prod(x.shape)
    assert total % out_features == 0, (
        "total number of elements must be divisible by out_features")
    n_rows = total // out_features
    out_shape = (n_rows, out_features)

    itemsize = jnp.dtype(x.dtype).itemsize
    layout = _pick_lane_dense_layout(total, itemsize, block_bytes)
    if layout is None:
        # No lane-dense / VMEM-safe tiling: XLA's reshape is metadata-only
        # (a bitcast) for contiguous inputs — this is the optimal path anyway.
        return x.reshape(out_shape)

    lane, rows, row_tile = layout
    grid = (rows // row_tile,)

    # Metadata-only relayout to the lane-dense staging shape.
    x2d = x.reshape(rows, lane)

    copied = pl.pallas_call(
        _copy_kernel,
        out_shape=jax.ShapeDtypeStruct((rows, lane), x.dtype),
        grid_spec=pltpu.PrefetchScalarGridSpec(
            num_scalar_prefetch=0,
            grid=grid,
            in_specs=[
                # Could add pipeline_mode=pl.Buffered(3) to smooth DMA jitter;
                # kept at the default double-buffering for VMEM headroom.
                pl.BlockSpec((row_tile, lane), lambda i: (i, 0)),
            ],
            out_specs=pl.BlockSpec((row_tile, lane), lambda i: (i, 0)),
        ),
        compiler_params=pltpu.CompilerParams(
            # "parallel" lets v7x shard grid tiles across its 2 TensorCores;
            # measured no-op on single-core v5e/v6e.
            dimension_semantics=("parallel",),
        ),
    )(x2d)

    # Metadata-only reshape to the user-visible (-1, out_features) layout.
    return copied.reshape(out_shape)


if __name__ == "__main__":
    key = jax.random.PRNGKey(0)
    k1, k2, k3 = jax.random.split(key, 3)

    # Case 1: NCHW-like f32 input (matches the module's typical use).
    x1 = jax.random.normal(k1, (2, 4, 16, 16), dtype=jnp.float32)
    y1 = reshape_last_dim_1d(x1, 32)
    jax.block_until_ready(y1)
    ref1 = x1.reshape(-1, 32)
    assert y1.shape == ref1.shape and jnp.array_equal(y1, ref1)

    # Case 2: bf16 input (exercises the packed-sublane tile selection).
    x2 = (jax.random.normal(k2, (4, 8, 32, 32), dtype=jnp.float32)
          .astype(jnp.bfloat16))
    y2 = reshape_last_dim_1d(x2, 64)
    jax.block_until_ready(y2)
    ref2 = x2.reshape(-1, 64)
    assert y2.shape == ref2.shape and jnp.array_equal(y2, ref2)

    # Case 3: small block_bytes override to exercise a multi-step grid
    # (same code path used for large, HBM-roofline-bound inputs).
    x3 = jax.random.normal(k3, (8, 8, 32, 32), dtype=jnp.float32)
    y3 = reshape_last_dim_1d(x3, 128, block_bytes=64 * 1024)
    jax.block_until_ready(y3)
    ref3 = x3.reshape(-1, 128)
    assert y3.shape == ref3.shape and jnp.array_equal(y3, ref3)

    print("KERNEL_OK")
</pallas_src>

<mosaic_0001>
module attributes {stable_mosaic.version = 11 : i64} {
  func.func @_copy_kernel(%arg0: i32, %arg1: memref<8x256xf32, #tpu.memory_space<vmem>>, %arg2: memref<8x256xf32, #tpu.memory_space<vmem>>) attributes {dimension_semantics = [#tpu.dimension_semantics<parallel>], iteration_bounds = array<i64: 1>, scalar_prefetch = 0 : i64, scratch_operands = 0 : i64, tpu.core_type = #tpu.core_type<tc>, window_params = [{transform_indices = @transform_0, window_bounds = array<i64: 8, 256>}, {transform_indices = @transform_1, window_bounds = array<i64: 8, 256>}]} {
    %c0 = arith.constant 0 : index
    %c0_0 = arith.constant 0 : index
    %0 = vector.load %arg1[%c0, %c0_0] : memref<8x256xf32, #tpu.memory_space<vmem>>, vector<8x256xf32>
    %c0_1 = arith.constant 0 : index
    %c0_2 = arith.constant 0 : index
    %1 = vector.load %arg2[%c0_1, %c0_2] : memref<8x256xf32, #tpu.memory_space<vmem>>, vector<8x256xf32>
    tpu.vector_store %arg2[%c0_1, %c0_2], %0 {strides = array<i32>} : memref<8x256xf32, #tpu.memory_space<vmem>>, vector<8x256xf32>,
    return
  }
  func.func @transform_0(%arg0: i32) -> (i32, i32) {
    %c0_i32 = arith.constant 0 : i32
    %c0_i32_0 = arith.constant 0 : i32
    return %arg0, %c0_i32 : i32, i32
  }
  func.func @transform_1(%arg0: i32) -> (i32, i32) {
    %c0_i32 = arith.constant 0 : i32
    %c0_i32_0 = arith.constant 0 : i32
    return %arg0, %c0_i32 : i32, i32
  }
}

</mosaic_0001>

<bundles_post_ra>
// kernel: tpu_custom_call.1
= control target key start
LH: loop header
LB: loop body
LE: loop exit
PB: predicated region body
PF: predicated region fallthrough
CT: control target
= control target key end

     0   :  { %6 = vsyncpa [#allocation3], 0  ;;  %s116_s0 = inlined_call_operand.hbm [shape: f32[8,256], index: 0, kind: input, shape index: {}]   ;;  %s117_s1 = inlined_call_operand.hbm [shape: f32[8,256], index: 1, kind: output, shape index: {}]  }
   0x1   :  { %7 = vsyncpa [#allocation4], 0  ;;  %s13_s8 = sshll.u32 %s116_s0, 4  ;;  %s98_s9 = smov [#allocation2]   ;;  %s14_s8 = int_to_ptr.hbm [resolvable:$true] %s13_s8 }
   0x2   :  { %s15_s10 = sshll.u32 %s98_s9, 4  ;;  %s16_s10 = int_to_ptr.vmem [resolvable:$true] %s15_s10 }
   0x3   :  { %18 = dma.hbm_to_vmem [thread:$0]  %s14_s8, 256, %s16_s10, [#allocation3]  }
   0x4   :  { %94 = dma.done.wait [#allocation3], 256  }
   0x5   :  { %95 = vsyncadd [#allocation3], 4294967040  ;;  %s99_s11 = smov [#allocation5]   ;;  %s34_s15 = sshll.u32 %s117_s1, 4  ;;  %v23_v0 = vld [vmem:[#allocation2] sm:$0xff]  ;;  %v24_v1 = vld [vmem:[#allocation2 + $0x8] sm:$0xff]  ;;  %s35_s15 = int_to_ptr.hbm [resolvable:$true] %s34_s15 }
   0x6   :  { %s32_s12 = sshll.u32 %s99_s11, 4  ;;  %25 = vst [vmem:[#allocation5] sm:$0xff] %v23_v0  ;;  %s33_s12 = int_to_ptr.vmem [resolvable:$true] %s32_s12 }
   0x7   :  { %26 = vst [vmem:[#allocation5 + $0x8] sm:$0xff] %v24_v1 }
   0x8   :  { %37 = dma.vmem_to_hbm [thread:$0]  %s33_s12, 256, %s35_s15, [#allocation4]  }
   0x9   :  { %96 = dma.done.wait [#allocation4], 256  }
   0xa   :  { %97 = vsyncadd [#allocation4], 4294967040 }
   0xb   :  { %42 = vsyncpa [#allocation3], 1 }
   0xc   :  { %43 = vsyncpa [#allocation4], 1 }

</bundles_post_ra>
